<compile_context>
chip_gen: v6e
topology: v6e:2x2x1
jax: 0.10.0
libtpu: 0.0.40
codegen_flags: <defaults>
</compile_context>

<pallas_src>
import math
import functools

import jax
import jax.numpy as jnp
import numpy as np
from jax.experimental import pallas as pl
from jax.experimental.pallas import tpu as pltpu

_LANE = 128


def _omega_kernel(w_ref, x_ref, o_ref):
    # w_ref : (C, C)         pre-clamped, pre-transposed block-diagonal weight
    # x_ref : (1, C, T)      one (batch, spatial-tile) slab, T multiple of 128
    # o_ref : (1, C, T)
    o_ref[0] = jnp.dot(
        w_ref[...], x_ref[0], preferred_element_type=jnp.float32
    ).astype(o_ref.dtype)


def _build_block_diag_weight(omg, *, n, C, max_val, dtype):
    """W_full[g*n+m, g*n+k] = clamp(omega_blk(g))[k, m]  -> y = W_full @ x."""
    G = C // n
    w = jnp.clip(omg, -max_val, max_val)          # (blocks, n, n)
    wt = jnp.swapaxes(w, -1, -2)                  # (blocks, n, n) == omega.T per block
    if omg.shape[0] == 1:
        wt = jnp.broadcast_to(wt, (G, n, n))
    eye = jnp.eye(G, dtype=wt.dtype)              # (G, G)
    # result[g, m, h, k] = eye[g, h] * wt[g, m, k]  -> reshape to (C, C) block-diag
    w_full = jnp.einsum('gh,gmk->gmhk', eye, wt).reshape(C, C)
    return w_full.astype(dtype)


def omega_layer_pallas(x, omg, *, n, max_val=1.0, target_tile_bytes=4 << 20):
    """x: (B, C, H, W) NCHW;  omg: (blocks, n, n).  Returns (B, C, H, W)."""
    B, C, H, W = x.shape
    assert C % n == 0
    G = C // n
    blocks = omg.shape[0]
    assert blocks in (1, G)
    HW = H * W
    itemsize = jnp.dtype(x.dtype).itemsize

    # ---- choose a large, lane-aligned spatial tile -------------------------
    bytes_per_lane_col = C * itemsize
    max_tile = max(_LANE, (target_tile_bytes // bytes_per_lane_col) // _LANE * _LANE)
    hw_ceil = -(-HW // _LANE) * _LANE                 # round HW up to lanes
    hw_tile = min(max_tile, hw_ceil)
    hw_pad = -(-HW // hw_tile) * hw_tile              # pad HW to multiple of tile
    n_tiles = hw_pad // hw_tile

    # ---- wrapper-side prep: clamp + transpose + block-diag weight ----------
    w_full = _build_block_diag_weight(omg, n=n, C=C, max_val=float(max_val),
                                      dtype=x.dtype)

    xg = x.reshape(B, C, HW)
    if hw_pad != HW:
        xg = jnp.pad(xg, ((0, 0), (0, 0), (0, hw_pad - HW)))

    # ---- VMEM budget: in + out double-buffered + resident weight -----------
    tile_bytes = C * hw_tile * itemsize
    w_bytes = C * C * itemsize
    vmem_need = 2 * (2 * tile_bytes) + 2 * w_bytes
    vmem_limit = int(min(48 << 20, max(2 * vmem_need, 16 << 20)))

    yg = pl.pallas_call(
        _omega_kernel,
        out_shape=jax.ShapeDtypeStruct((B, C, hw_pad), x.dtype),
        grid_spec=pltpu.PrefetchScalarGridSpec(
            num_scalar_prefetch=0,
            grid=(B, n_tiles),
            in_specs=[
                pl.BlockSpec((C, C), lambda b, s: (0, 0)),          # weight stays resident
                pl.BlockSpec((1, C, hw_tile), lambda b, s: (b, 0, s)),
            ],
            out_specs=pl.BlockSpec((1, C, hw_tile), lambda b, s: (b, 0, s)),
        ),
        compiler_params=pltpu.CompilerParams(
            dimension_semantics=("parallel", "parallel"),
            vmem_limit_bytes=vmem_limit,
        ),
    )(w_full, xg)

    if hw_pad != HW:
        yg = yg[..., :HW]
    return yg.reshape(B, C, H, W)


def make_omega_params(key, n, ch, init=0.05, global_omega=True):
    """Deterministic re-implementation of OmegaLayer.__init__ parameter shapes."""
    blocks = 1 if global_omega else ch // n
    raw = jax.random.normal(key, (blocks, n, n), dtype=jnp.float32) * (init / math.sqrt(2))
    omg = raw - jnp.swapaxes(raw, -2, -1)     # antisymmetric
    return omg


def omega_layer_ref(x, omg, *, n, max_val=1.0):
    """Pure-JAX reference mirroring the PyTorch forward."""
    B, C, H, W = x.shape
    G = C // n
    w = jnp.clip(omg, -max_val, max_val)
    g = x.reshape(B, G, n, H, W)
    if omg.shape[0] == 1:
        y = jnp.einsum('nm,bgnhw->bgmhw', w[0], g)
    else:
        y = jnp.einsum('gnm,bgnhw->bgmhw', w, g)
    return y.reshape(B, C, H, W)


if __name__ == "__main__":
    key = jax.random.PRNGKey(0)
    k_w, k_x, k_w2 = jax.random.split(key, 3)

    # small shapes consistent with the module: n=4 oscillator dims, ch=8 channels
    B, C, H, W = 2, 8, 16, 16
    n = 4

    x = jax.random.normal(k_x, (B, C, H, W), dtype=jnp.float32)

    # case 1: global omega (blocks = 1)
    omg_g = make_omega_params(k_w, n=n, ch=C, init=0.05, global_omega=True)
    y = jax.block_until_ready(omega_layer_pallas(x, omg_g, n=n, max_val=1.0))
    y_ref = omega_layer_ref(x, omg_g, n=n, max_val=1.0)
    assert y.shape == (B, C, H, W)
    assert np.allclose(np.asarray(y), np.asarray(y_ref), atol=1e-5, rtol=1e-5)

    # case 2: per-group omega (blocks = C // n)
    omg_l = make_omega_params(k_w2, n=n, ch=C, init=0.05, global_omega=False)
    y2 = jax.block_until_ready(omega_layer_pallas(x, omg_l, n=n, max_val=1.0))
    y2_ref = omega_layer_ref(x, omg_l, n=n, max_val=1.0)
    assert np.allclose(np.asarray(y2), np.asarray(y2_ref), atol=1e-5, rtol=1e-5)

    print("KERNEL_OK")
</pallas_src>

<mosaic_0001>
module attributes {stable_mosaic.version = 11 : i64} {
  func.func @_omega_kernel(%arg0: i32, %arg1: i32, %arg2: memref<8x8xf32, #tpu.memory_space<vmem>>, %arg3: memref<1x8x256xf32, #tpu.memory_space<vmem>>, %arg4: memref<1x8x256xf32, #tpu.memory_space<vmem>>) attributes {dimension_semantics = [#tpu.dimension_semantics<parallel>, #tpu.dimension_semantics<parallel>], iteration_bounds = array<i64: 2, 1>, scalar_prefetch = 0 : i64, scratch_operands = 0 : i64, tpu.core_type = #tpu.core_type<tc>, window_params = [{pipeline_mode = #tpu.pipeline_mode<synchronous>, transform_indices = @transform_0, window_bounds = array<i64: 8, 8>}, {transform_indices = @transform_1, window_bounds = array<i64: 1, 8, 256>}, {transform_indices = @transform_2, window_bounds = array<i64: 1, 8, 256>}]} {
    %c0 = arith.constant 0 : index
    %c0_0 = arith.constant 0 : index
    %0 = vector.load %arg2[%c0, %c0_0] : memref<8x8xf32, #tpu.memory_space<vmem>>, vector<8x8xf32>
    %c0_1 = arith.constant 0 : index
    %c0_2 = arith.constant 0 : index
    %c0_3 = arith.constant 0 : index
    %1 = vector.load %arg3[%c0_1, %c0_2, %c0_3] : memref<1x8x256xf32, #tpu.memory_space<vmem>>, vector<1x8x256xf32>
    %2 = vector.shape_cast %1 : vector<1x8x256xf32> to vector<8x256xf32>
    %cst = arith.constant dense<0.000000e+00> : vector<8x256xf32>
    %3 = tpu.matmul %0, %2, %cst {dimension_numbers = #tpu.dot_dimension_numbers<[1], [0], [0], [1], [0, 0, 1, 1], [], []>} : vector<8x8xf32>, vector<8x256xf32>, vector<8x256xf32> -> vector<8x256xf32>
    %c0_4 = arith.constant 0 : index
    %c0_5 = arith.constant 0 : index
    %c0_6 = arith.constant 0 : index
    %4 = vector.load %arg4[%c0_4, %c0_5, %c0_6] : memref<1x8x256xf32, #tpu.memory_space<vmem>>, vector<1x8x256xf32>
    %5 = vector.shape_cast %4 : vector<1x8x256xf32> to vector<8x256xf32>
    %6 = vector.shape_cast %3 : vector<8x256xf32> to vector<1x8x256xf32>
    tpu.vector_store %arg4[%c0_4, %c0_5, %c0_6], %6 {strides = array<i32>} : memref<1x8x256xf32, #tpu.memory_space<vmem>>, vector<1x8x256xf32>,
    return
  }
  func.func @transform_0(%arg0: i32, %arg1: i32) -> (i32, i32) {
    %c0_i32 = arith.constant 0 : i32
    %c0_i32_0 = arith.constant 0 : i32
    %c0_i32_1 = arith.constant 0 : i32
    return %c0_i32, %c0_i32_0 : i32, i32
  }
  func.func @transform_1(%arg0: i32, %arg1: i32) -> (i32, i32, i32) {
    %c0_i32 = arith.constant 0 : i32
    %c0_i32_0 = arith.constant 0 : i32
    return %arg0, %c0_i32, %arg1 : i32, i32, i32
  }
  func.func @transform_2(%arg0: i32, %arg1: i32) -> (i32, i32, i32) {
    %c0_i32 = arith.constant 0 : i32
    %c0_i32_0 = arith.constant 0 : i32
    return %arg0, %c0_i32, %arg1 : i32, i32, i32
  }
}

</mosaic_0001>

<bundles_post_ra>
// kernel: tpu_custom_call.1
= control target key start
LH: loop header
LB: loop body
LE: loop exit
PB: predicated region body
PF: predicated region fallthrough
CT: control target
= control target key end

     0   :  { %7 = vsyncpa [#allocation3], 0  ;;  %s806_s0 = inlined_call_operand.hbm [shape: f32[8,8], index: 0, kind: input, shape index: {}]   ;;  %s807_s1 = inlined_call_operand.hbm [shape: f32[2,8,256], index: 1, kind: input, shape index: {}]   ;;  %s808_s2 = inlined_call_operand.hbm [shape: f32[2,8,256], index: 2, kind: output, shape index: {}]  }
   0x1   :  { %8 = vsyncpa [#allocation6], 0 }
   0x2   :  { %10 = vsyncpa [#allocation6 + $0x1], 0 }
   0x3   :  { %11 = vsyncpa [#allocation4], 0 }
   0x4   :  { %13 = vsyncpa [#allocation4 + $0x1], 0  ;;  %s639_s9 = smov 0   ;;  %s641_s10 = smov 0  }
   0x5   :  { %s643_s11 = smov 0   ;;  %s645_s12 = smov 0  }
   0x6   :  { %s647_s13 = smov 0   ;;  %s649_s14 = smov 0  }
   0x7 LB: > { %s386_s15 = sadd.s32 4294967295, %s618_s14   ;;  %s387_s16 = sadd.s32 4294967294, %s618_s14   ;;  %s618_s14 = sphi %s649_s14, %s19_s14   ;;  %s614_s13 = sphi %s647_s13, %s825_s13   ;;  %s610_s12 = sphi %s645_s12, %s824_s12   ;;  %s606_s11 = sphi %s643_s11, %s823_s11   ;;  %s602_s10 = sphi %s641_s10, %s822_s10   ;;  %s598_s9 = sphi %s639_s9, %s821_s9  }
   0x8   : > { %p74_p0 = scmp.ne.s32.totalorder %s602_s10, %s598_s9  ;;  %p673_p1 = scmp.eq.s32.totalorder %s386_s15, 0 }
   0x9   : > { %p677_p2 = scmp.eq.s32.totalorder %s386_s15, 1  ;;  %p106_p3 = scmp.eq.s32.totalorder %s387_s16, 1 }
   0xa   : > { %p683_p4 = por %p673_p1, %p74_p0  ;;  %p388_p5 = scmp.ge.s32.totalorder %s618_s14, 1 }
   0xb   : > { %p688_p6 = por %p106_p3, %p74_p0  ;;  %p113_p7 = scmp.lt.s32.totalorder %s618_s14, 3 }
   0xc   : > { %s812_s19 = scalar_select %p683_p4, 1, 0 }
   0xd   : > { %s813_s20 = scalar_select %p688_p6, 1, 0 }
   0xe   : > { %p693_p8 = pnand %p388_p5, %p113_p7  ;;  %s620_s22 = smov [#allocation2]  }
   0xf   : > { %s126_s23 = sshll.u32 %s620_s22, 4  ;;  %s31_s25 = sadd.s32 1, %s614_s13  ;;  %s127_s23 = int_to_ptr.vmem [resolvable:$true] %s126_s23 }
  0x10   : > { %p414_p10 = pneg %p693_p8  ;;  %s61_s26 = sadd.s32 1, %s606_s11 }
  0x11   : > { %p33_p12 = scmp.ge.s32.totalorder %s31_s25, 2  ;;  %s491_s27 = scalar_lea.vmem %s127_s23, 128 }
  0x12   : > { %p702_p11 = pnand %p414_p10, %p673_p1  ;;  %p492_p0 = scmp.ne.s32.totalorder %s127_s23, %s491_s27 }
  0x13   : > { %p499_p7 = scmp.lt.s32.totalorder %s127_s23, %s127_s23  ;;  %p500_p6 = scmp.lt.s32.totalorder %s491_s27, %s491_s27 }
  0x14   : > { %p482_p13 = pneg %p702_p11 }
  0x15   : > { %p501_p9 = por %p500_p6, %p499_p7 }
  0x16   : > { %p494_p3 = pnand %p492_p0, %p482_p13 }
  0x18   : > { %p495_p5 = pneg %p494_p3 }
  0x1a   : > { %p502_p4 = pnand %p501_p9, %p495_p5 }
  0x1c   : > { %505 = shalt.err (!%p502_p4)
}
  0x1d   : > { %417 = dma.hbm_to_vmem [thread:$0]  (!%p702_p11), %s806_s0, 128, %s127_s23, [#allocation3]  }
  0x1e   : > { %s827_s25 = smov (%p33_p12, %s31_s25), 0  ;;  %p68_p6 = scmp.ne.s32.totalorder %s606_s11, %s602_s10 }
  0x1f   : > { %p69_p4 = scmp.eq.s32.totalorder %s618_s14, 0  ;;  %s56_s30 = ssub.s32 %s614_s13, %s827_s25 }
  0x20   : > { %p427_p9 = scmp.lt.s32.totalorder %s618_s14, 2  ;;  %p59_p10 = scmp.eq.s32.totalorder %s56_s30, 0 }
  0x21   : > { %p70_p13 = por %p69_p4, %p68_p6  ;;  %p725_p0 = por %p677_p2, %p68_p6 }
  0x22   : > { %s137_s4 = sand.u32 1, %s606_s11   ;;  %s404_s7 = sshll.u32 %s614_s13, 8 }
  0x23   : > { %s731_s5 = scalar_select %p59_p10, %s606_s11, %s61_s26  }
  0x24   : > { %s391_s6 = sshll.u32 %s137_s4, 4  ;;  %s149_s16 = scalar_lea.hbm %s807_s1, %s404_s7 }
  0x25   : > { %s141_s22 = scalar_lea.vmem [#allocation5], %s391_s6  ;;  %p737_p11 = pnand %p427_p9, %p70_p13 }
  0x26   : > { %s151_s23 = sshll.u32 %s141_s22, 4  ;;  %s138_s18 = scalar_lea.sflag [#allocation6], %s137_s4  ;;  %s152_s23 = int_to_ptr.vmem [resolvable:$true] %s151_s23 }
  0x27   : > { %p508_p2 = pneg %p737_p11  ;;  %s519_s27 = scalar_lea.vmem %s152_s23, 256 }
  0x28   : > { %p520_p12 = scmp.ne.s32.totalorder %s152_s23, %s519_s27  ;;  %s621_s26 = smov [#allocation5]  }
  0x29   : > { %s524_s28 = sshll.u32 %s621_s26, 4  ;;  %s525_s28 = int_to_ptr.vmem [resolvable:$false] %s524_s28 }
  0x2a   : > { %p522_p3 = pnand %p520_p12, %p508_p2  ;;  %s526_s29 = scalar_lea.vmem %s525_s28, 512 }
  0x2b   : > { %p527_p7 = scmp.lt.s32.totalorder %s152_s23, %s525_s28  ;;  %p528_p6 = scmp.lt.s32.totalorder %s526_s29, %s519_s27 }
  0x2c   : > { %p523_p5 = pneg %p522_p3 }
  0x2d   : > { %p529_p4 = por %p528_p6, %p527_p7 }
  0x2f   : > { %p530_p10 = pnand %p529_p4, %p523_p5 }
  0x31   : > { %533 = shalt.err (!%p530_p10)
}
  0x32   : > { %421 = dma.hbm_to_vmem [thread:$0]  (!%p737_p11), %s149_s16, 256, %s152_s23, %s138_s18  }
  0x33   : > { %160 = sbr.rel (%p693_p8) target bundleno = 272 (0x110), region = 28 }
  0x38   : > { %585 = dma.done.wait (%p673_p1), [#allocation3], 128  }
  0x39   : > { %587 = vsyncadd (%p673_p1), [#allocation3], 4294967168  ;;  %s752_s30 = sand.u32 1, %s602_s10   ;;  %p818_p9 = scmp.ne.s32.totalorder %s812_s19, 0 }
  0x3a   : > { %s396_s4 = sshll.u32 %s752_s30, 4  ;;  %s167_s6 = scalar_lea.sflag [#allocation6], %s752_s30 }
  0x3b   : > { %s170_s7 = scalar_lea.vmem [#allocation5], %s396_s4 }
  0x3c   : > { %589 = dma.done.wait (%p818_p9), %s167_s6, 256  }
  0x3d   : > { %591 = vsyncadd (%p818_p9), %s167_s6, 4294967040  ;;  %v622_v0 = vmov 0.0   ;;  %v195_v1 = vld [vmem:[%s170_s7 + $0x8] sm:$0xff]  ;;  %v194_v2 = vld [vmem:[%s170_s7] sm:$0xff]  ;;  %vm196_vm0 = vcmask 64512   ;;  %s190_s17 = scalar_lea.vmem [#allocation7], %s396_s4 }
  0x3e   : > { %264 = vmatprep.mubr.f32.mxu0 %v622_v0  ;;  %v193_v3 = vld [vmem:[#allocation2] sm:$0xff]  ;;  %230 = vmatprep.subr.mxu0 %v195_v1  ;;  %s290_s21 = sshll.u32 %s190_s17, 4  ;;  %s405_s8 = sshll.u32 %s610_s12, 8  ;;  %s761_s21 = int_to_ptr.vmem [resolvable:$true] %s290_s21 }
  0x3f   : > { %231 = vmatpush1.msra.mxu0 %v194_v2  ;;  %s288_s16 = scalar_lea.hbm %s808_s2, %s405_s8  ;;  %s274_s22 = scalar_lea.sflag [#allocation4], %s752_s30 }
  0x40   : > { %398 = vmatmul.mubr.msk.f32.vlgmr.msra.gmra.mxu0 %vm196_vm0, %v193_v3  ;;  %s534_s23 = scalar_lea.vmem %s761_s21, 256  ;;  %s623_s12 = smov [#allocation7]  }
  0x41   : > { %p535_p1 = scmp.ne.s32.totalorder %s761_s21, %s534_s23  ;;  %s538_s24 = sshll.u32 %s623_s12, 4  ;;  %s539_s24 = int_to_ptr.vmem [resolvable:$false] %s538_s24 }
  0x42   : > { %s540_s18 = scalar_lea.vmem %s539_s24, 512  ;;  %p541_p11 = scmp.lt.s32.totalorder %s761_s21, %s539_s24 }
  0x43   : > { %p536_p8 = pnand %p535_p1, %p725_p0  ;;  %p542_p2 = scmp.lt.s32.totalorder %s540_s18, %s534_s23 }
  0x45   : > { %p537_p13 = pneg %p536_p8  ;;  %p543_p12 = por %p542_p2, %p541_p11 }
  0x47   : > { %p544_p3 = pnand %p543_p12, %p537_p13 }
 0x100   : > { %v266_v4 = vpop.f32.mrf.mxu0 }
 0x101   : > { %271 = vst [vmem:[%s190_s17] sm:$0xff] %v266_v4 }
 0x102   : > { %v268_v5 = vpop.f32.mrf.mxu0 }
 0x103   : > { %272 = vst [vmem:[%s190_s17 + $0x8] sm:$0xff] %v268_v5 }
 0x104   : > { %547 = shalt.err (!%p544_p3)
}
 0x105   : > { %s548_s27 = scalar_lea.hbm %s288_s16, 256  ;;  %s552_s29 = scalar_lea.hbm %s808_s2, 512 }
 0x106   : > { %p549_p5 = scmp.ne.s32.totalorder %s288_s16, %s548_s27  ;;  %p553_p4 = scmp.lt.s32.totalorder %s288_s16, %s808_s2 }
 0x107   : > { %p554_p10 = scmp.lt.s32.totalorder %s552_s29, %s548_s27 }
 0x108   : > { %p550_p7 = pnand %p549_p5, %p725_p0 }
 0x109   : > { %p555_p9 = por %p554_p10, %p553_p4 }
 0x10a   : > { %p551_p6 = pneg %p550_p7 }
 0x10c   : > { %p556_p1 = pnand %p555_p9, %p551_p6 }
 0x10e   : > { %559 = shalt.err (!%p556_p1)
}
 0x10f   : > { %412 = dma.vmem_to_hbm [thread:$0]  (%p725_p0), %s761_s21, 256, %s288_s16, %s274_s22  }
 0x110 PF: > { %s302_s6 = sand.u32 1, %s598_s9   ;;  %p819_p8 = scmp.ne.s32.totalorder %s813_s20, 0 }
 0x111   : > { %p820_p13 = scmp.ge.s32.totalorder %s618_s14, 2  ;;  %s303_s7 = scalar_lea.sflag [#allocation4], %s302_s6 }
 0x113   : > { %p423_p11 = pnand %p820_p13, %p819_p8 }
 0x115   : > { %p424_p2 = pneg %p423_p11 }
 0x117   : > { %593 = dma.done.wait (%p424_p2), %s303_s7, 256  }
 0x118   : > { %595 = vsyncadd (%p424_p2), %s303_s7, 4294967040  ;;  %s19_s14 = sadd.s32 1, %s618_s14   ;;  %s821_s9 = smov %s602_s10 }
 0x119   : > { %p16_p12 = scmp.ge.s32.totalorder %s19_s14, 4   ;;  %s822_s10 = smov %s606_s11 }
 0x11a   : > { %s823_s11 = smov %s731_s5  ;;  %s824_s12 = smov %s614_s13 }
 0x11b   : > { %s825_s13 = smov %s827_s25  ;;  %18 = sbr.rel (!%p16_p12) target bundleno = 7 (0x7), region = 78 }
 0x120   :  { %308 = vsyncpa [#allocation3], 1 }
 0x121   :  { %310 = vsyncpa [#allocation3 + $0x1], 1 }
 0x122   :  { %311 = vsyncpa [#allocation6], 1 }
 0x123   :  { %313 = vsyncpa [#allocation6 + $0x1], 1 }
 0x124   :  { %314 = vsyncpa [#allocation4], 1 }
 0x125   :  { %316 = vsyncpa [#allocation4 + $0x1], 1 }

</bundles_post_ra>
